<compile_context>
chip_gen: v7x
topology: tpu7x:2x2x1
jax: 0.10.0
libtpu: 0.0.40
codegen_flags: <defaults>
</compile_context>

<pallas_src>
import jax
import jax.numpy as jnp
from jax.experimental import pallas as pl
from jax.experimental.pallas import tpu as pltpu

EPS = 1e-5
_MiB = 1024 * 1024


# ----------------------------------------------------------------------------- kernels
def _layernorm_f32(x, gamma, beta):
    x = x.astype(jnp.float32)
    mean = jnp.mean(x, axis=-1, keepdims=True)
    centered = x - mean
    var = jnp.mean(centered * centered, axis=-1, keepdims=True)
    xn = centered * jax.lax.rsqrt(var + EPS)
    return xn * gamma.astype(jnp.float32) + beta.astype(jnp.float32)


def _fused_lmhead_kernel(x_ref, g_ref, b_ref, w_ref, o_ref, xn_ref):
    # x_ref:  (tm, D)  rows of the flattened input
    # w_ref:  (tn, D)  slice of the vocab projection, native PyTorch (V, D) layout
    # o_ref:  (tm, tn) logits tile
    # xn_ref: (tm, D)  VMEM scratch holding normalized rows (matmul dtype)

    # LayerNorm only once per row tile (first vocab step); reused for all j.
    @pl.when(pl.program_id(1) == 0)
    def _():
        xn_ref[...] = _layernorm_f32(
            x_ref[...], g_ref[...], b_ref[...]).astype(xn_ref.dtype)

    # xn @ W^T: contract the feature dim of both operands on the MXU,
    # native weight dtype, f32 accumulation.
    o_ref[...] = jax.lax.dot_general(
        xn_ref[...], w_ref[...],
        dimension_numbers=(((1,), (1,)), ((), ())),
        preferred_element_type=jnp.float32,
    ).astype(o_ref.dtype)


def _layernorm_kernel(x_ref, g_ref, b_ref, o_ref):
    o_ref[...] = _layernorm_f32(
        x_ref[...], g_ref[...], b_ref[...]).astype(o_ref.dtype)


def _proj_kernel(xn_ref, w_ref, o_ref):
    o_ref[...] = jax.lax.dot_general(
        xn_ref[...], w_ref[...],
        dimension_numbers=(((1,), (1,)), ((), ())),
        preferred_element_type=jnp.float32,
    ).astype(o_ref.dtype)


# ----------------------------------------------------------------------------- tiling
def _ceil_to(x, m):
    return (x + m - 1) // m * m


def _vmem_limit_bytes():
    try:
        phys = pltpu.get_tpu_info().vmem_capacity_bytes
    except Exception:
        phys = 64 * _MiB  # conservative fallback (v7x-sized)
    # Leave headroom for Mosaic internal scratch / the output pipeline:
    # ~40 MiB on 64 MiB parts (v7x), ~96 MiB on 128 MiB parts (v5e/v6e).
    limit = max(32 * _MiB, min(phys - 24 * _MiB, 96 * _MiB))
    return limit, phys


def _pick_tiles(M, D, V, x_bytes, w_bytes, out_bytes, acc_bytes):
    vmem_limit, phys = _vmem_limit_bytes()
    tn_max = 2048 if phys >= 128 * _MiB else 1024
    tm_max = 512

    M8 = _ceil_to(M, 8)
    # Row tile: large for prefill (weight-stream arithmetic intensity ~ tm),
    # collapsed to an 8/128-aligned size for small M (decode).
    if M8 >= tm_max:
        tm = tm_max
    elif M8 > 128:
        tm = _ceil_to(M8, 128)
    else:
        tm = M8

    # Vocab tile: largest lane-aligned tile not exceeding V (no weight padding).
    if V < 128:
        tn = V
    elif V <= tn_max:
        tn = (V // 128) * 128
    else:
        tn = tn_max

    def usage(tm_, tn_):
        return (2 * tn_ * D * w_bytes          # double-buffered weight stream
                + 2 * tm_ * D * x_bytes        # double-buffered activations
                + tm_ * D * acc_bytes          # normalized-row scratch / input
                + 2 * tm_ * tn_ * out_bytes    # double-buffered logits tile
                + 4 * D * 4)                   # gamma / beta

    budget = int(0.8 * vmem_limit)
    tn_floor = min(tn, 256)
    while usage(tm, tn) > budget and tn > tn_floor:
        tn = max(tn_floor, ((tn // 2) // 128) * 128)
    tm_floor = min(tm, 64)
    while usage(tm, tn) > budget and tm > tm_floor:
        tm = max(tm_floor, ((tm // 2) // 8) * 8)

    return tm, tn, vmem_limit


# ----------------------------------------------------------------------------- wrapper
@jax.jit
def lm_head(x, gamma, beta, w_out):
    """LMHead forward: LayerNorm(x) @ W_out^T.

    x: [B, S, D]; gamma/beta: [D]; w_out: [V, D] (PyTorch Linear layout, no bias).
    Returns [B, S, V] logits in x.dtype.
    """
    B, S, D = x.shape
    V, Dw = w_out.shape
    assert D == Dw
    M = B * S

    compute_dtype = w_out.dtype      # feed the MXU in the weights' native dtype
    out_dtype = x.dtype

    tm, tn, vmem_limit = _pick_tiles(
        M, D, V,
        jnp.dtype(x.dtype).itemsize,
        jnp.dtype(w_out.dtype).itemsize,
        jnp.dtype(out_dtype).itemsize,
        jnp.dtype(compute_dtype).itemsize,
    )

    M_pad = _ceil_to(M, tm)
    grid_m = M_pad // tm
    grid_v = pl.cdiv(V, tn)

    x2d = x.reshape(M, D)
    if M_pad != M:
        x2d = jnp.pad(x2d, ((0, M_pad - M), (0, 0)))   # cheap: O(M*D) only
    g2d = gamma.reshape(1, D)
    b2d = beta.reshape(1, D)

    if grid_m == 1:
        # Decode-shaped call: LayerNorm hoisted into its own tiny kernel so the
        # projection grid carries no scratch and BOTH axes are "parallel"
        # (lets v7x shard the vocab axis across its two TensorCores).
        xn = pl.pallas_call(
            _layernorm_kernel,
            out_shape=jax.ShapeDtypeStruct((M_pad, D), compute_dtype),
            grid_spec=pltpu.PrefetchScalarGridSpec(
                num_scalar_prefetch=0,
                grid=(grid_m,),
                in_specs=[
                    pl.BlockSpec((tm, D), lambda i: (i, 0)),
                    pl.BlockSpec((1, D), lambda i: (0, 0)),
                    pl.BlockSpec((1, D), lambda i: (0, 0)),
                ],
                out_specs=pl.BlockSpec((tm, D), lambda i: (i, 0)),
            ),
            compiler_params=pltpu.CompilerParams(
                dimension_semantics=("parallel",),
            ),
        )(x2d, g2d, b2d)

        out = pl.pallas_call(
            _proj_kernel,
            out_shape=jax.ShapeDtypeStruct((M_pad, V), out_dtype),
            grid_spec=pltpu.PrefetchScalarGridSpec(
                num_scalar_prefetch=0,
                grid=(grid_m, grid_v),
                in_specs=[
                    pl.BlockSpec((tm, D), lambda i, j: (i, 0)),
                    pl.BlockSpec((tn, D), lambda i, j: (j, 0)),  # native (V, D) layout
                ],
                out_specs=pl.BlockSpec((tm, tn), lambda i, j: (i, j)),
            ),
            compiler_params=pltpu.CompilerParams(
                dimension_semantics=("parallel", "parallel"),
                vmem_limit_bytes=vmem_limit,
            ),
        )(xn, w_out)
    else:
        # Prefill / training: fused kernel. LayerNorm cached once per row tile in a
        # VMEM scratch carried across the vocab axis (hence "arbitrary" on axis 1);
        # the M axis is "parallel" for megacore sharding.
        out = pl.pallas_call(
            _fused_lmhead_kernel,
            out_shape=jax.ShapeDtypeStruct((M_pad, V), out_dtype),
            grid_spec=pltpu.PrefetchScalarGridSpec(
                num_scalar_prefetch=0,
                grid=(grid_m, grid_v),
                in_specs=[
                    pl.BlockSpec((tm, D), lambda i, j: (i, 0)),
                    pl.BlockSpec((1, D), lambda i, j: (0, 0)),
                    pl.BlockSpec((1, D), lambda i, j: (0, 0)),
                    pl.BlockSpec((tn, D), lambda i, j: (j, 0)),  # native (V, D) layout
                ],
                out_specs=pl.BlockSpec((tm, tn), lambda i, j: (i, j)),
                scratch_shapes=[pltpu.VMEM((tm, D), compute_dtype)],
            ),
            compiler_params=pltpu.CompilerParams(
                dimension_semantics=("parallel", "arbitrary"),
                vmem_limit_bytes=vmem_limit,
            ),
        )(x2d, g2d, b2d, w_out)

    return out[:M].reshape(B, S, V)


# ----------------------------------------------------------------------------- reference / test
def reference(x, gamma, beta, w_out):
    xn = _layernorm_f32(x, gamma, beta)
    return (xn @ w_out.astype(jnp.float32).T).astype(x.dtype)


if __name__ == "__main__":
    key = jax.random.PRNGKey(0)
    k1, k2, k3, k4, k5, k6 = jax.random.split(key, 6)

    def make_case(kx, kw, batch, seq, d_model, vocab, dtype):
        x = jax.random.normal(kx, (batch, seq, d_model), jnp.float32).astype(dtype)
        gamma = jnp.ones((d_model,), dtype)     # LayerNorm default init
        beta = jnp.zeros((d_model,), dtype)
        w = (jax.random.normal(kw, (vocab, d_model), jnp.float32)
             * (d_model ** -0.5)).astype(dtype)
        return x, gamma, beta, w

    def check(name, case, atol, rtol):
        x, g, b, w = case
        out = lm_head(x, g, b, w)
        jax.block_until_ready(out)
        ref = reference(x, g, b, w)
        assert out.shape == ref.shape, (name, out.shape, ref.shape)
        ok = bool(jnp.allclose(out.astype(jnp.float32), ref.astype(jnp.float32),
                               atol=atol, rtol=rtol))
        assert ok, f"mismatch in {name}"

    # 1) decode-shaped call (single row tile -> split LN + projection path), f32.
    check("decode_f32", make_case(k1, k2, 2, 8, 32, 256, jnp.float32),
          atol=1e-4, rtol=1e-4)
    # 2) prefill-shaped call (fused kernel, ragged vocab tail, no weight pad), f32.
    check("prefill_f32", make_case(k3, k4, 2, 512, 128, 1300, jnp.float32),
          atol=2e-3, rtol=2e-3)
    # 3) bf16 weights/activations (bf16 MXU path), loose tolerance.
    check("decode_bf16", make_case(k5, k6, 2, 8, 64, 384, jnp.bfloat16),
          atol=8e-2, rtol=5e-2)

    print("KERNEL_OK")
</pallas_src>

<mosaic_0001>
module attributes {stable_mosaic.version = 11 : i64} {
  func.func @_proj_kernel(%arg0: i32, %arg1: i32, %arg2: memref<16x32xf32, #tpu.memory_space<vmem>>, %arg3: memref<256x32xf32, #tpu.memory_space<vmem>>, %arg4: memref<16x256xf32, #tpu.memory_space<vmem>>) attributes {dimension_semantics = [#tpu.dimension_semantics<parallel>, #tpu.dimension_semantics<parallel>], iteration_bounds = array<i64: 1, 1>, scalar_prefetch = 0 : i64, scratch_operands = 0 : i64, tpu.core_type = #tpu.core_type<tc>, window_params = [{transform_indices = @transform_0, window_bounds = array<i64: 16, 32>}, {transform_indices = @transform_1, window_bounds = array<i64: 256, 32>}, {transform_indices = @transform_2, window_bounds = array<i64: 16, 256>}]} {
    %c0 = arith.constant 0 : index
    %c0_0 = arith.constant 0 : index
    %0 = vector.load %arg2[%c0, %c0_0] : memref<16x32xf32, #tpu.memory_space<vmem>>, vector<16x32xf32>
    %c0_1 = arith.constant 0 : index
    %c0_2 = arith.constant 0 : index
    %1 = vector.load %arg3[%c0_1, %c0_2] : memref<256x32xf32, #tpu.memory_space<vmem>>, vector<256x32xf32>
    %cst = arith.constant dense<0.000000e+00> : vector<16x256xf32>
    %2 = tpu.matmul %0, %1, %cst {dimension_numbers = #tpu.dot_dimension_numbers<[1], [1], [0], [0], [0, 0, 1, 0], [], []>} : vector<16x32xf32>, vector<256x32xf32>, vector<16x256xf32> -> vector<16x256xf32>
    %c0_3 = arith.constant 0 : index
    %c0_4 = arith.constant 0 : index
    %3 = vector.load %arg4[%c0_3, %c0_4] : memref<16x256xf32, #tpu.memory_space<vmem>>, vector<16x256xf32>
    tpu.vector_store %arg4[%c0_3, %c0_4], %2 {strides = array<i32>} : memref<16x256xf32, #tpu.memory_space<vmem>>, vector<16x256xf32>,
    return
  }
  func.func @transform_0(%arg0: i32, %arg1: i32) -> (i32, i32) {
    %c0_i32 = arith.constant 0 : i32
    %c0_i32_0 = arith.constant 0 : i32
    return %arg0, %c0_i32 : i32, i32
  }
  func.func @transform_1(%arg0: i32, %arg1: i32) -> (i32, i32) {
    %c0_i32 = arith.constant 0 : i32
    %c0_i32_0 = arith.constant 0 : i32
    return %arg1, %c0_i32 : i32, i32
  }
  func.func @transform_2(%arg0: i32, %arg1: i32) -> (i32, i32) {
    %c0_i32 = arith.constant 0 : i32
    return %arg0, %arg1 : i32, i32
  }
}

module attributes {stable_mosaic.version = 11 : i64} {
  func.func @_layernorm_kernel(%arg0: i32, %arg1: memref<16x32xf32, #tpu.memory_space<vmem>>, %arg2: memref<1x32xf32, #tpu.memory_space<vmem>>, %arg3: memref<1x32xf32, #tpu.memory_space<vmem>>, %arg4: memref<16x32xf32, #tpu.memory_space<vmem>>) attributes {dimension_semantics = [#tpu.dimension_semantics<parallel>], iteration_bounds = array<i64: 1>, scalar_prefetch = 0 : i64, scratch_operands = 0 : i64, tpu.core_type = #tpu.core_type<tc>, window_params = [{transform_indices = @transform_0, window_bounds = array<i64: 16, 32>}, {pipeline_mode = #tpu.pipeline_mode<synchronous>, transform_indices = @transform_1, window_bounds = array<i64: 1, 32>}, {pipeline_mode = #tpu.pipeline_mode<synchronous>, transform_indices = @transform_2, window_bounds = array<i64: 1, 32>}, {transform_indices = @transform_3, window_bounds = array<i64: 16, 32>}]} {
    %c0 = arith.constant 0 : index
    %c0_0 = arith.constant 0 : index
    %0 = vector.load %arg1[%c0, %c0_0] : memref<16x32xf32, #tpu.memory_space<vmem>>, vector<16x32xf32>
    %c0_1 = arith.constant 0 : index
    %c0_2 = arith.constant 0 : index
    %1 = vector.load %arg2[%c0_1, %c0_2] : memref<1x32xf32, #tpu.memory_space<vmem>>, vector<1x32xf32>
    %c0_3 = arith.constant 0 : index
    %c0_4 = arith.constant 0 : index
    %2 = vector.load %arg3[%c0_3, %c0_4] : memref<1x32xf32, #tpu.memory_space<vmem>>, vector<1x32xf32>
    %cst = arith.constant dense<0.000000e+00> : vector<16xf32>
    %3 = vector.multi_reduction <add>, %0, %cst [1] : vector<16x32xf32> to vector<16xf32>
    %4 = vector.shape_cast %3 : vector<16xf32> to vector<16x1xf32>
    %cst_5 = arith.constant 3.200000e+01 : f32
    %5 = vector.broadcast %cst_5 : f32 to vector<16x1xf32>
    %6 = arith.divf %4, %5 : vector<16x1xf32>
    %7 = vector.broadcast %6 : vector<16x1xf32> to vector<16x32xf32>
    %8 = arith.subf %0, %7 : vector<16x32xf32>
    %9 = arith.mulf %8, %8 : vector<16x32xf32>
    %cst_6 = arith.constant dense<0.000000e+00> : vector<16xf32>
    %10 = vector.multi_reduction <add>, %9, %cst_6 [1] : vector<16x32xf32> to vector<16xf32>
    %11 = vector.shape_cast %10 : vector<16xf32> to vector<16x1xf32>
    %cst_7 = arith.constant 3.200000e+01 : f32
    %12 = vector.broadcast %cst_7 : f32 to vector<16x1xf32>
    %13 = arith.divf %11, %12 : vector<16x1xf32>
    %cst_8 = arith.constant 9.99999974E-6 : f32
    %14 = vector.broadcast %cst_8 : f32 to vector<16x1xf32>
    %15 = arith.addf %13, %14 : vector<16x1xf32>
    %16 = math.rsqrt %15 : vector<16x1xf32>
    %17 = vector.broadcast %16 : vector<16x1xf32> to vector<16x32xf32>
    %18 = arith.mulf %8, %17 : vector<16x32xf32>
    %19 = vector.broadcast %1 : vector<1x32xf32> to vector<16x32xf32>
    %20 = arith.mulf %18, %19 : vector<16x32xf32>
    %21 = vector.broadcast %2 : vector<1x32xf32> to vector<16x32xf32>
    %22 = arith.addf %20, %21 : vector<16x32xf32>
    %c0_9 = arith.constant 0 : index
    %c0_10 = arith.constant 0 : index
    %23 = vector.load %arg4[%c0_9, %c0_10] : memref<16x32xf32, #tpu.memory_space<vmem>>, vector<16x32xf32>
    tpu.vector_store %arg4[%c0_9, %c0_10], %22 {strides = array<i32>} : memref<16x32xf32, #tpu.memory_space<vmem>>, vector<16x32xf32>,
    return
  }
  func.func @transform_0(%arg0: i32) -> (i32, i32) {
    %c0_i32 = arith.constant 0 : i32
    %c0_i32_0 = arith.constant 0 : i32
    return %arg0, %c0_i32 : i32, i32
  }
  func.func @transform_1(%arg0: i32) -> (i32, i32) {
    %c0_i32 = arith.constant 0 : i32
    %c0_i32_0 = arith.constant 0 : i32
    %c0_i32_1 = arith.constant 0 : i32
    return %c0_i32, %c0_i32_0 : i32, i32
  }
  func.func @transform_2(%arg0: i32) -> (i32, i32) {
    %c0_i32 = arith.constant 0 : i32
    %c0_i32_0 = arith.constant 0 : i32
    %c0_i32_1 = arith.constant 0 : i32
    return %c0_i32, %c0_i32_0 : i32, i32
  }
  func.func @transform_3(%arg0: i32) -> (i32, i32) {
    %c0_i32 = arith.constant 0 : i32
    %c0_i32_0 = arith.constant 0 : i32
    return %arg0, %c0_i32 : i32, i32
  }
}

</mosaic_0001>

<bundles_post_ra>
// kernel: lm_head.2
= control target key start
LH: loop header
LB: loop body
LE: loop exit
PB: predicated region body
PF: predicated region fallthrough
CT: control target
= control target key end

     0   :  { %8 = vsyncpa [#allocation3], 0  ;;  %s116_s12 = smov [#allocation2]   ;;  %s169_s0 = inlined_call_operand.hbm [shape: f32[16,32], index: 0, kind: input, shape index: {}]   ;;  %s170_s1 = inlined_call_operand.vmem [shape: f32[1,32], index: 1, kind: input, shape index: {}]   ;;  %s171_s2 = inlined_call_operand.vmem [shape: f32[1,32], index: 2, kind: input, shape index: {}]   ;;  %s172_s3 = inlined_call_operand.vmem [shape: f32[16,32], index: 3, kind: output, shape index: {}]  }
   0x1   :  { %s14_s13 = sshll.u32 %s116_s12, 4  ;;  %s92_s16 = scalar_lea.hbm %s169_s0, 256  ;;  %s15_s13 = int_to_ptr.vmem [resolvable:$true] %s14_s13 }
   0x2   :  { %p93_p0 = scmp.ne.s32.totalorder %s169_s0, %s92_s16  ;;  %p96_p1 = scmp.lt.u32.totalorder %s92_s16, %s169_s0 }
   0x4   :  { %p98_p2 = pnand %p96_p1, %p93_p0 }
   0x6   :  { %101 = shalt.err (!%p98_p2)
}
   0x7   :  { %s102_s21 = scalar_lea.vmem %s15_s13, 256  ;;  %p107_p4 = scmp.lt.s32.totalorder %s15_s13, %s15_s13 }
   0x8   :  { %p103_p3 = scmp.ne.s32.totalorder %s15_s13, %s102_s21  ;;  %p108_p5 = scmp.lt.s32.totalorder %s102_s21, %s102_s21 }
   0xa   :  { %p109_p6 = por %p108_p5, %p107_p4 }
   0xc   :  { %p110_p7 = pnand %p109_p6, %p103_p3 }
   0xe   :  { %113 = shalt.err (!%p110_p7)
}
   0xf   :  { %s117_s22 = smov 128   ;;  %s118_s23 = smov 8  }
  0x10   :  { %20 = dma.hbm_to_vmem [thread:$0]  %s169_s0, 256, %s15_s13, [#allocation3], %s117_s22, %s117_s22, %s118_s23  }
  0x11   :  { %114 = dma.done.wait [#allocation3], 256  }
  0x12   :  { %115 = vsyncadd [#allocation3], 4294967040  ;;  %vm32_vm0 = vcmask 261120   ;;  %v28_v0 = vld [vmem:[#allocation2] sm:$0xff]  ;;  %v29_v1 = vld [vmem:[#allocation2 + $0x8] sm:$0xff] }
  0x13   :  { %v33_v2 = vsel %vm32_vm0, %v28_v0, 0.0  ;;  %v36_v3 = vsel %vm32_vm0, %v29_v1, 0.0  ;;  %v83_v21 = vld [vmem:[%s170_s1] ss:$0 sm:$0xff] }
  0x14   :  { %34 = vadd.xlane.f32.xlu0 %v33_v2  ;;  %v84_v23 = vld [vmem:[%s171_s2] ss:$0 sm:$0xff] }
  0x18   :  { %37 = vadd.xlane.f32.xlu0 %v36_v3 }
  0xa1   :  { %v35_v4 = vpop.xlane.xlu0 %34 }
  0xa2   :  { %v40_v5 = vmul.f32 0.03125, %v35_v4 }
  0xa4   :  { %v42_v6 = vsub.f32 %v28_v0, %v40_v5 }
  0xa5   :  { %v38_v7 = vpop.xlane.xlu0 %37 }
  0xa6   :  { %v41_v8 = vmul.f32 0.03125, %v38_v7  ;;  %v44_v9 = vmul.f32 %v42_v6, %v42_v6 }
  0xa8   :  { %v43_v10 = vsub.f32 %v29_v1, %v41_v8  ;;  %v46_v11 = vsel %vm32_vm0, %v44_v9, 0.0 }
  0xa9   :  { %47 = vadd.xlane.f32.xlu1 %v46_v11 }
  0xaa   :  { %v45_v12 = vmul.f32 %v43_v10, %v43_v10 }
  0xac   :  { %v49_v13 = vsel %vm32_vm0, %v45_v12, 0.0 }
  0xad   :  { %50 = vadd.xlane.f32.xlu1 %v49_v13 }
 0x136   :  { %v48_v14 = vpop.xlane.xlu1 %47 }
 0x137   :  { %v52_v15 = vmul.f32 0.03125, %v48_v14 }
 0x139   :  { %v54_v16 = vadd.f32 1e-05, %v52_v15 }
 0x13a   :  { %v51_v17 = vpop.xlane.xlu1 %50 }
 0x13b   :  { %88 = vrsqrt.f32 %v54_v16  ;;  %v53_v18 = vmul.f32 0.03125, %v51_v17 }
 0x13d   :  { %v55_v19 = vadd.f32 1e-05, %v53_v18 }
 0x13f   :  { %90 = vrsqrt.f32 %v55_v19 }
 0x145   :  { %v89_v20 = vpop.eup %88 }
 0x146   :  { %v58_v22 = vmul.f32 %v89_v20, %v42_v6 }
 0x148   :  { %v66_v24 = vmul.f32 %v83_v21, %v58_v22 }
 0x149   :  { %v91_v25 = vpop.eup %90 }
 0x14a   :  { %v74_v26 = vadd.f32 %v84_v23, %v66_v24  ;;  %v59_v27 = vmul.f32 %v91_v25, %v43_v10 }
 0x14c   :  { %76 = vst.msk [vmem:[%s172_s3] sm:$0xff] %vm32_vm0, %v74_v26  ;;  %v67_v28 = vmul.f32 %v83_v21, %v59_v27 }
 0x14e   :  { %v75_v29 = vadd.f32 %v84_v23, %v67_v28 }
 0x150   :  { %77 = vst.msk [vmem:[%s172_s3 + $0x8] sm:$0xff] %vm32_vm0, %v75_v29 }
 0x151   :  { %82 = vsyncpa [#allocation3], 1 }

// kernel: lm_head.3
= control target key start
LH: loop header
LB: loop body
LE: loop exit
PB: predicated region body
PF: predicated region fallthrough
CT: control target
= control target key end

     0   :  { %vm46_vm0 = vcmask 261120   ;;  %s621_s0 = inlined_call_operand.vmem [shape: f32[16,32], index: 0, kind: input, shape index: {}]   ;;  %s622_s1 = inlined_call_operand.vmem [shape: f32[256,32], index: 1, kind: input, shape index: {}]   ;;  %s623_s2 = inlined_call_operand.hbm [shape: f32[16,256], index: 2, kind: output, shape index: {}]  }
   0x1   :  { %v30_v0 = vld [vmem:[%s622_s1 + $0x80] sm:$0xff]  ;;  %v31_v1 = vld [vmem:[%s622_s1 + $0x88] sm:$0xff]  ;;  %vm436_vm1 = vmpackc.low %vm46_vm0, %vm46_vm0 }
   0x2   :  { %v14_v2 = vld [vmem:[%s622_s1] sm:$0xff]  ;;  %v316_v3 = vpack.c.bf16 %v31_v1, %v30_v0  ;;  %v15_v5 = vld [vmem:[%s622_s1 + $0x8] sm:$0xff]  ;;  %v32_v6 = vld [vmem:[%s622_s1 + $0x90] sm:$0xff] }
   0x3   :  { %v319_v7 = vpack.c.bf16 %v15_v5, %v14_v2  ;;  %v33_v8 = vld [vmem:[%s622_s1 + $0x98] sm:$0xff]  ;;  %v16_v10 = vld [vmem:[%s622_s1 + $0x10] sm:$0xff]  ;;  %v34_v12 = vld [vmem:[%s622_s1 + $0xa0] sm:$0xff] }
   0x4   :  { %318 = vmatprep.subr.msk.bf16.mxu0 %vm436_vm1, %v316_v3  ;;  %364 = vmatprep.subr.msk.bf16.mxu1 %vm436_vm1, %v316_v3  ;;  %v322_v9 = vpack.c.bf16 %v33_v8, %v32_v6  ;;  %v17_v11 = vld [vmem:[%s622_s1 + $0x18] sm:$0xff]  ;;  %v35_v13 = vld [vmem:[%s622_s1 + $0xa8] sm:$0xff]  ;;  %v476_v16 = vld [vmem:[%s621_s0] sm:$0xff] }
   0x5   :  { %321 = vmatpush3.bf16.xpose.msk.msra.mxu0 %vm436_vm1, %v319_v7  ;;  %372 = vmatpush3.bf16.xpose.msk.msra.mxu1 %vm436_vm1, %v319_v7  ;;  %v325_v14 = vpack.c.bf16 %v17_v11, %v16_v10  ;;  %v328_v15 = vpack.c.bf16 %v35_v13, %v34_v12  ;;  %v481_v17 = vld [vmem:[%s621_s0 + $0x8] sm:$0xff] }
   0x6   :  { %324 = vmatprep.subr.msk.bf16.mxu0 %vm436_vm1, %v322_v9  ;;  %365 = vmatprep.subr.msk.bf16.mxu1 %vm436_vm1, %v322_v9 }
   0x7   :  { %7 = vsyncpa [#allocation3], 0  ;;  %v18_v18 = vld [vmem:[%s622_s1 + $0x20] sm:$0xff]  ;;  %v19_v19 = vld [vmem:[%s622_s1 + $0x28] sm:$0xff]  ;;  %312 = vmatprep.mubr.msk.f32.mxu0 %vm46_vm0, %v476_v16  ;;  %314 = vmatprep.mubr.msk.f32.mxu1 %vm46_vm0, %v481_v17  ;;  %s407_s19 = smov [#allocation2]  }
   0x8   :  { %v36_v20 = vld [vmem:[%s622_s1 + $0xb0] sm:$0xff]  ;;  %v37_v21 = vld [vmem:[%s622_s1 + $0xb8] sm:$0xff]  ;;  %v331_v22 = vpack.c.bf16 %v19_v19, %v18_v18  ;;  %v38_v26 = vld [vmem:[%s622_s1 + $0xc0] sm:$0xff]  ;;  %s235_s20 = sshll.u32 %s407_s19, 4  ;;  %s236_s20 = int_to_ptr.vmem [resolvable:$true] %s235_s20 }
   0x9   :  { %v334_v23 = vpack.c.bf16 %v37_v21, %v36_v20  ;;  %v20_v24 = vld [vmem:[%s622_s1 + $0x30] sm:$0xff]  ;;  %v21_v25 = vld [vmem:[%s622_s1 + $0x38] sm:$0xff]  ;;  %v39_v27 = vld [vmem:[%s622_s1 + $0xc8] sm:$0xff]  ;;  %p388_p1 = scmp.lt.s32.totalorder %s236_s20, %s236_s20 }
   0xa   :  { %v337_v28 = vpack.c.bf16 %v21_v25, %v20_v24  ;;  %v340_v29 = vpack.c.bf16 %v39_v27, %v38_v26  ;;  %v22_v30 = vld [vmem:[%s622_s1 + $0x40] sm:$0xff]  ;;  %v23_v31 = vld [vmem:[%s622_s1 + $0x48] sm:$0xff]  ;;  %v40_v32 = vld [vmem:[%s622_s1 + $0xd0] sm:$0xff] }
   0xb   :  { %v41_v33 = vld [vmem:[%s622_s1 + $0xd8] sm:$0xff]  ;;  %v343_v34 = vpack.c.bf16 %v23_v31, %v22_v30  ;;  %v24_v36 = vld [vmem:[%s622_s1 + $0x50] sm:$0xff]  ;;  %v42_v38 = vld [vmem:[%s622_s1 + $0xe0] sm:$0xff] }
   0xc   :  { %v346_v35 = vpack.c.bf16 %v41_v33, %v40_v32  ;;  %v25_v37 = vld [vmem:[%s622_s1 + $0x58] sm:$0xff]  ;;  %v43_v39 = vld [vmem:[%s622_s1 + $0xe8] sm:$0xff]  ;;  %v26_v42 = vld [vmem:[%s622_s1 + $0x60] sm:$0xff] }
   0xd   :  { %327 = vmatpush3.bf16.xpose.msk.msra.mxu0 %vm436_vm1, %v325_v14  ;;  %373 = vmatpush3.bf16.xpose.msk.msra.mxu1 %vm436_vm1, %v325_v14  ;;  %v349_v40 = vpack.c.bf16 %v25_v37, %v24_v36  ;;  %v352_v41 = vpack.c.bf16 %v43_v39, %v42_v38  ;;  %v27_v43 = vld [vmem:[%s622_s1 + $0x68] sm:$0xff]  ;;  %v44_v44 = vld [vmem:[%s622_s1 + $0xf0] sm:$0xff]  ;;  %v45_v45 = vld [vmem:[%s622_s1 + $0xf8] sm:$0xff] }
   0xe   :  { %330 = vmatprep.subr.msk.bf16.mxu0 %vm436_vm1, %v328_v15  ;;  %366 = vmatprep.subr.msk.bf16.mxu1 %vm436_vm1, %v328_v15  ;;  %v355_v46 = vpack.c.bf16 %v27_v43, %v26_v42  ;;  %v358_v47 = vpack.c.bf16 %v45_v45, %v44_v44  ;;  %v28_v48 = vld [vmem:[%s622_s1 + $0x70] sm:$0xff]  ;;  %v29_v49 = vld [vmem:[%s622_s1 + $0x78] sm:$0xff]  ;;  %s383_s1 = scalar_lea.vmem %s236_s20, 512 }
   0xf   :  { %v361_v50 = vpack.c.bf16 %v29_v49, %v28_v48  ;;  %p384_p0 = scmp.ne.s32.totalorder %s236_s20, %s383_s1  ;;  %p389_p2 = scmp.lt.s32.totalorder %s383_s1, %s383_s1 }
  0x11   :  { %p390_p3 = por %p389_p2, %p388_p1 }
  0x13   :  { %p391_p4 = pnand %p390_p3, %p384_p0 }
  0x15   :  { %333 = vmatpush3.bf16.xpose.msk.msra.mxu0 %vm436_vm1, %v331_v22  ;;  %374 = vmatpush3.bf16.xpose.msk.msra.mxu1 %vm436_vm1, %v331_v22 }
  0x16   :  { %336 = vmatprep.subr.msk.bf16.mxu0 %vm436_vm1, %v334_v23  ;;  %367 = vmatprep.subr.msk.bf16.mxu1 %vm436_vm1, %v334_v23 }
  0x1d   :  { %339 = vmatpush3.bf16.xpose.msk.msra.mxu0 %vm436_vm1, %v337_v28  ;;  %375 = vmatpush3.bf16.xpose.msk.msra.mxu1 %vm436_vm1, %v337_v28 }
  0x1e   :  { %342 = vmatprep.subr.msk.bf16.mxu0 %vm436_vm1, %v340_v29  ;;  %368 = vmatprep.subr.msk.bf16.mxu1 %vm436_vm1, %v340_v29 }
  0x25   :  { %345 = vmatpush3.bf16.xpose.msk.msra.mxu0 %vm436_vm1, %v343_v34  ;;  %376 = vmatpush3.bf16.xpose.msk.msra.mxu1 %vm436_vm1, %v343_v34 }
  0x26   :  { %348 = vmatprep.subr.msk.bf16.mxu0 %vm436_vm1, %v346_v35  ;;  %369 = vmatprep.subr.msk.bf16.mxu1 %vm436_vm1, %v346_v35 }
  0x2d   :  { %351 = vmatpush3.bf16.xpose.msk.msra.mxu0 %vm436_vm1, %v349_v40  ;;  %377 = vmatpush3.bf16.xpose.msk.msra.mxu1 %vm436_vm1, %v349_v40 }
  0x2e   :  { %354 = vmatprep.subr.msk.bf16.mxu0 %vm436_vm1, %v352_v41  ;;  %370 = vmatprep.subr.msk.bf16.mxu1 %vm436_vm1, %v352_v41 }
  0x35   :  { %357 = vmatpush3.bf16.xpose.msk.msra.mxu0 %vm436_vm1, %v355_v46  ;;  %378 = vmatpush3.bf16.xpose.msk.msra.mxu1 %vm436_vm1, %v355_v46 }
  0x36   :  { %360 = vmatprep.subr.msk.bf16.mxu0 %vm436_vm1, %v358_v47  ;;  %371 = vmatprep.subr.msk.bf16.mxu1 %vm436_vm1, %v358_v47 }
  0x3d   :  { %363 = vmatpush3.bf16.xpose.msk.msra.mxu0 %vm436_vm1, %v361_v50  ;;  %379 = vmatpush3.bf16.xpose.msk.msra.mxu1 %vm436_vm1, %v361_v50 }
  0x44   :  { %313 = vmatmul.mubr.msk.f32.vlgmr.msra.gmra.mrb[0].mxu0 %vm46_vm0, %v476_v16  ;;  %315 = vmatmul.mubr.msk.f32.vlgmr.msra.gmra.mrb[0].mxu1 %vm46_vm0, %v481_v17 }
 0x117   :  { %v215_v51 = vpop.f32.mrb[0].mxu0  ;;  %v221_v52 = vpop.f32.mrb[0].mxu1 }
 0x118   :  { %226 = vst [vmem:[#allocation2] sm:$0xff] %v215_v51  ;;  %228 = vst [vmem:[#allocation2 + $0x10] sm:$0xff] %v221_v52  ;;  %v217_v53 = vpop.f32.mrb[1].mxu0  ;;  %v223_v54 = vpop.f32.mrb[1].mxu1 }
 0x119   :  { %227 = vst [vmem:[#allocation2 + $0x8] sm:$0xff] %v217_v53  ;;  %229 = vst [vmem:[#allocation2 + $0x18] sm:$0xff] %v223_v54 }
 0x11a   :  { %394 = shalt.err (!%p391_p4)
}
 0x11b   :  { %s395_s23 = scalar_lea.hbm %s623_s2, 512 }
 0x11c   :  { %p396_p5 = scmp.ne.s32.totalorder %s623_s2, %s395_s23  ;;  %p399_p6 = scmp.lt.u32.totalorder %s395_s23, %s623_s2 }
 0x11e   :  { %p401_p7 = pnand %p399_p6, %p396_p5 }
 0x120   :  { %404 = shalt.err (!%p401_p7)
}
 0x121   :  { %s408_s28 = smov 256   ;;  %s409_s29 = smov 16  }
 0x122   :  { %241 = dma.vmem_to_hbm [thread:$0]  %s236_s20, 512, %s623_s2, [#allocation3], %s408_s28, %s408_s28, %s409_s29  }
 0x123   :  { %405 = dma.done.wait [#allocation3], 512  }
 0x124   :  { %406 = vsyncadd [#allocation3], 4294966784 }
 0x125   :  { %245 = vsyncpa [#allocation3], 1 }

</bundles_post_ra>
